<compile_context>
chip_gen: v7x
topology: tpu7x:2x2x1
jax: 0.10.0
libtpu: 0.0.40
codegen_flags: <defaults>
</compile_context>

<pallas_src>
import functools

import jax
import jax.numpy as jnp
from jax import lax
from jax.experimental import pallas as pl
from jax.experimental.pallas import tpu as pltpu

_LANES = 128
_TIME_BLOCK = 8                          # decode steps per grid iteration (8-16)
_VMEM_LIMIT_BYTES = 32 * 1024 * 1024     # explicit scoped-VMEM limit (> v5e 16 MiB default)


def _round_up(x, m):
    return (x + m - 1) // m * m


def _sigmoid(x):
    # logistic(x) == 0.5*tanh(0.5*x) + 0.5 : one EUP push per gate instead of
    # exp + divide on the serial per-step critical path.
    return 0.5 * jnp.tanh(0.5 * x) + 0.5


# ---------------------------------------------------------------------------
# Pass A (parallel, batched): x-side gate contribution for all steps at once:
#   gx[t, :] = x[t] @ W_ih_comb + (b_ih + b_hh)
# ---------------------------------------------------------------------------
def _input_gates_kernel(x_ref, w_ref, b_ref, gx_ref):
    gx_ref[...] = jnp.dot(x_ref[...], w_ref[...],
                          preferred_element_type=jnp.float32) + b_ref[...]


# ---------------------------------------------------------------------------
# Pass B (sequential): the true recurrence only.  TT steps per grid iteration;
# (h, c) carried in a (2, HP) accumulator output block aliased with the initial
# state input, resident in VMEM across the whole grid.
# ---------------------------------------------------------------------------
def _lstm_recurrence_kernel(state0_ref, gx_ref, whh_ref, h_out_ref, state_ref,
                            *, t_total, t_padded):
    blk = pl.program_id(0)
    tt = gx_ref.shape[0]
    hp = state_ref.shape[1]

    @pl.when(blk == 0)
    def _():
        state_ref[...] = state0_ref[...]

    state = state_ref[...]                 # (2, HP) f32, resident across steps
    h0 = state[0:1, :]
    c0 = state[1:2, :]

    def step(t, carry):
        h, c = carry                       # (1, HP) f32 each
        gates = gx_ref[pl.ds(t, 1), :] + jnp.dot(
            h, whh_ref[...], preferred_element_type=jnp.float32)   # (1, 4*HP)
        # Lane-aligned gate split, PyTorch order [i | f | g | o]; math in f32.
        i_g = _sigmoid(gates[:, 0 * hp:1 * hp])
        f_g = _sigmoid(gates[:, 1 * hp:2 * hp])
        g_g = jnp.tanh(gates[:, 2 * hp:3 * hp])
        o_g = _sigmoid(gates[:, 3 * hp:4 * hp])
        c_new = f_g * c + i_g * g_g
        h_new = o_g * jnp.tanh(c_new)
        if t_total != t_padded:            # mask padded trailing steps only if any
            valid = (blk * tt + t) < t_total
            h_new = jnp.where(valid, h_new, h)
            c_new = jnp.where(valid, c_new, c)
        h_out_ref[pl.ds(t, 1), :] = h_new
        return h_new, c_new

    h_f, c_f = lax.fori_loop(0, tt, step, (h0, c0), unroll=True)
    # One packed (2, HP) store of the new state (single vst, no row slices).
    state_ref[...] = jnp.concatenate([h_f, c_f], axis=0)


# ---------------------------------------------------------------------------
# Pass C (parallel, batched): output projection + log-softmax over the
# lane-padded vocab (padded logits carry a -1e30 bias so they never matter).
# ---------------------------------------------------------------------------
def _proj_logsoftmax_kernel(h_ref, w_ref, b_ref, logp_ref):
    logits = jnp.dot(h_ref[...].astype(w_ref.dtype), w_ref[...],
                     preferred_element_type=jnp.float32) + b_ref[...]
    m = jnp.max(logits, axis=-1, keepdims=True)
    lse = m + jnp.log(jnp.sum(jnp.exp(logits - m), axis=-1, keepdims=True))
    logp_ref[...] = logits - lse


def prepare_decoder_params(w_ih, w_hh, b_ih, b_hh, w_out, b_out,
                           stream_dtype=jnp.bfloat16):
    """One-time weight preprocessing (hoisted out of the per-step path).

    w_ih: (4H, I) PyTorch weight_ih_l0 (gate rows i, f, g, o)
    w_hh: (4H, H) PyTorch weight_hh_l0;  b_ih, b_hh: (4H,)
    w_out: (V, H), b_out: (V,)  output Linear.
    """
    four_h, I = w_ih.shape
    H = four_h // 4
    V = w_out.shape[0]
    IP = _round_up(I, _LANES)
    HP = _round_up(H, _LANES)
    VP = _round_up(V, _LANES)

    w_ih = jnp.asarray(w_ih, jnp.float32)
    w_hh = jnp.asarray(w_hh, jnp.float32)
    b = jnp.asarray(b_ih, jnp.float32) + jnp.asarray(b_hh, jnp.float32)

    # Lane-aligned gate layout: 4 gate blocks of HP lanes each (order i,f,g,o).
    w_ih_p = jnp.zeros((IP, 4 * HP), jnp.float32)
    w_hh_p = jnp.zeros((HP, 4 * HP), jnp.float32)
    b_p = jnp.zeros((1, 4 * HP), jnp.float32)
    for k in range(4):
        w_ih_p = w_ih_p.at[:I, k * HP:k * HP + H].set(w_ih[k * H:(k + 1) * H, :].T)
        w_hh_p = w_hh_p.at[:H, k * HP:k * HP + H].set(w_hh[k * H:(k + 1) * H, :].T)
        b_p = b_p.at[0, k * HP:k * HP + H].set(b[k * H:(k + 1) * H])

    # Output projection, vocab padded to a full lane span; padded logits get a
    # very negative bias so the batched log-softmax ignores them.
    w_out_p = jnp.zeros((HP, VP), jnp.float32).at[:H, :V].set(
        jnp.asarray(w_out, jnp.float32).T)
    b_out_p = jnp.full((1, VP), -1e30, jnp.float32).at[0, :V].set(
        jnp.asarray(b_out, jnp.float32))

    return dict(
        w_ih=w_ih_p.astype(stream_dtype),   # bf16: batched x-side gate matmul
        w_hh=w_hh_p,                        # f32: recurrent weight (no drift)
        b=b_p,                              # f32 fused bias
        w_out=w_out_p.astype(stream_dtype), # bf16: batched projection
        b_out=b_out_p,                      # f32 (-1e30 pad mask must survive)
        I=I, H=H, V=V, IP=IP, HP=HP, VP=VP,
    )


def _const_spec(shape, single_buffer):
    """Constant-index (weight/bias) block; single-buffered when requested."""
    idx_map = lambda t: (0,) * len(shape)
    if single_buffer:
        return pl.BlockSpec(shape, idx_map, pipeline_mode=pl.Buffered(1))
    return pl.BlockSpec(shape, idx_map)


def rnn_decoder_decode(params, xs, h0, c0, *, single_buffer_weights=True):
    """Run T sequential RNNDecoder.forward() steps (3 pallas_calls total).

    xs: (T, I) pre-embedded inputs.   h0, c0: (1, 1, H) initial LSTM state.
    Returns (log_probs (T, V), (h_T (1,1,H), c_T (1,1,H))).
    """
    I, H, V = params["I"], params["H"], params["V"]
    IP, HP, VP = params["IP"], params["HP"], params["VP"]
    T = xs.shape[0]
    TT = _TIME_BLOCK
    TP = _round_up(max(T, 1), TT)
    n_blk = TP // TT

    cp_par = pltpu.CompilerParams(dimension_semantics=("parallel",),
                                  vmem_limit_bytes=_VMEM_LIMIT_BYTES)
    cp_seq = pltpu.CompilerParams(dimension_semantics=("arbitrary",),
                                  vmem_limit_bytes=_VMEM_LIMIT_BYTES)

    # Streamed input: 2-D, lane-padded, pre-cast to bf16 (halves DMA bytes).
    xs_p = jnp.zeros((TP, IP), jnp.float32).at[:T, :I].set(
        xs.astype(jnp.float32)).astype(params["w_ih"].dtype)

    state0 = jnp.zeros((2, HP), jnp.float32)
    state0 = state0.at[0, :H].set(h0.reshape(H).astype(jnp.float32))
    state0 = state0.at[1, :H].set(c0.reshape(H).astype(jnp.float32))

    # ---- Pass A: batched x-side gate precompute (parallel over time blocks).
    gx = pl.pallas_call(
        _input_gates_kernel,
        grid=(n_blk,),
        in_specs=[
            pl.BlockSpec((TT, IP), lambda t: (t, 0)),
            _const_spec((IP, 4 * HP), single_buffer_weights),
            _const_spec((1, 4 * HP), single_buffer_weights),
        ],
        out_specs=pl.BlockSpec((TT, 4 * HP), lambda t: (t, 0)),
        out_shape=jax.ShapeDtypeStruct((TP, 4 * HP), jnp.float32),
        compiler_params=cp_par,
    )(xs_p, params["w_ih"], params["b"])

    # ---- Pass B: sequential recurrence (h @ W_hh + gx[t]), TT steps per
    #      grid iteration, aliased (2, HP) state accumulator.
    h_all, state_t = pl.pallas_call(
        functools.partial(_lstm_recurrence_kernel, t_total=T, t_padded=TP),
        grid=(n_blk,),
        in_specs=[
            pl.BlockSpec((2, HP), lambda t: (0, 0)),          # initial state
            pl.BlockSpec((TT, 4 * HP), lambda t: (t, 0)),     # precomputed gx
            _const_spec((HP, 4 * HP), single_buffer_weights), # W_hh (f32)
        ],
        out_specs=(
            pl.BlockSpec((TT, HP), lambda t: (t, 0)),         # per-step h
            pl.BlockSpec((2, HP), lambda t: (0, 0)),          # carried state
        ),
        out_shape=(
            jax.ShapeDtypeStruct((TP, HP), jnp.float32),
            jax.ShapeDtypeStruct((2, HP), jnp.float32),
        ),
        input_output_aliases={0: 1},          # update the state buffer in place
        compiler_params=cp_seq,
    )(state0, gx, params["w_hh"])

    # ---- Pass C: batched projection + log-softmax (parallel over time blocks).
    logp = pl.pallas_call(
        _proj_logsoftmax_kernel,
        grid=(n_blk,),
        in_specs=[
            pl.BlockSpec((TT, HP), lambda t: (t, 0)),
            _const_spec((HP, VP), single_buffer_weights),
            _const_spec((1, VP), single_buffer_weights),
        ],
        out_specs=pl.BlockSpec((TT, VP), lambda t: (t, 0)),
        out_shape=jax.ShapeDtypeStruct((TP, VP), jnp.float32),
        compiler_params=cp_par,
    )(h_all, params["w_out"], params["b_out"])

    log_probs = logp[:T, :V]
    h_t = state_t[0, :H].reshape(1, 1, H)
    c_t = state_t[1, :H].reshape(1, 1, H)
    return log_probs, (h_t, c_t)


def rnn_decoder_step(params, embedded_input, state, *, single_buffer_weights=True):
    """Exact RNNDecoder.forward(): one step -> (log_probs (1, V), (h, c))."""
    h0, c0 = state
    log_probs, new_state = rnn_decoder_decode(
        params, embedded_input.reshape(1, -1), h0, c0,
        single_buffer_weights=single_buffer_weights)
    return log_probs, new_state


def _reference_decode(xs, h0, c0, w_ih, w_hh, b_ih, b_hh, w_out, b_out):
    """Pure-JAX f32 reference: T sequential LSTM-cell + Linear + log_softmax."""
    H = h0.shape[-1]
    h = h0.reshape(1, H)
    c = c0.reshape(1, H)
    out = []
    for t in range(xs.shape[0]):
        x2 = xs[t].reshape(1, -1)
        gates = x2 @ w_ih.T + h @ w_hh.T + b_ih + b_hh
        i_g = jax.nn.sigmoid(gates[:, 0 * H:1 * H])
        f_g = jax.nn.sigmoid(gates[:, 1 * H:2 * H])
        g_g = jnp.tanh(gates[:, 2 * H:3 * H])
        o_g = jax.nn.sigmoid(gates[:, 3 * H:4 * H])
        c = f_g * c + i_g * g_g
        h = o_g * jnp.tanh(c)
        logits = h @ w_out.T + b_out
        out.append(jax.nn.log_softmax(logits, axis=1)[0])
    return jnp.stack(out), (h.reshape(1, 1, H), c.reshape(1, 1, H))


if __name__ == "__main__":
    input_size, hidden_size, output_dict_size = 32, 32, 64
    num_steps = 8
    key = jax.random.PRNGKey(0)
    ks = jax.random.split(key, 7)

    def xavier_uniform(k, shape):
        fan_out, fan_in = shape
        bound = jnp.sqrt(6.0 / (fan_in + fan_out))
        return jax.random.uniform(k, shape, jnp.float32, -bound, bound)

    # LSTM params (PyTorch layout), init per RNNDecoder.init_weight().
    w_ih = xavier_uniform(ks[0], (4 * hidden_size, input_size))
    w_hh = xavier_uniform(ks[1], (4 * hidden_size, hidden_size))
    b_ih = jnp.zeros((4 * hidden_size,), jnp.float32)
    b_hh = jnp.zeros((4 * hidden_size,), jnp.float32)

    # Output Linear params (PyTorch default init U(-1/sqrt(H), 1/sqrt(H))).
    lin_bound = 1.0 / jnp.sqrt(jnp.float32(hidden_size))
    w_out = jax.random.uniform(ks[2], (output_dict_size, hidden_size),
                               jnp.float32, -lin_bound, lin_bound)
    b_out = jax.random.uniform(ks[3], (output_dict_size,),
                               jnp.float32, -lin_bound, lin_bound)

    # One-time weight preprocessing (transpose / gate layout / bias fold / bf16).
    params = prepare_decoder_params(w_ih, w_hh, b_ih, b_hh, w_out, b_out)

    # Inputs: a short sequence of embedded inputs and an initial (h, c) state.
    xs = jax.random.normal(ks[4], (num_steps, input_size), jnp.float32)
    h0 = jax.random.normal(ks[5], (1, 1, hidden_size), jnp.float32)
    c0 = jax.random.normal(ks[6], (1, 1, hidden_size), jnp.float32)

    def _run_all(single_buffer):
        lp1, (h1, c1) = rnn_decoder_step(params, xs[0], (h0, c0),
                                         single_buffer_weights=single_buffer)
        lps, (ht, ct) = rnn_decoder_decode(params, xs, h0, c0,
                                           single_buffer_weights=single_buffer)
        jax.block_until_ready((lp1, h1, c1, lps, ht, ct))
        return lp1, h1, c1, lps, ht, ct

    try:
        logp_1, h_1, c_1, logp_seq, h_t, c_t = _run_all(True)
    except Exception:
        # pl.Buffered(1) single-buffering of resident weights is a pure-VMEM
        # optimization; fall back to default double-buffering if this
        # JAX/Mosaic build rejects buffer_count=1.
        logp_1, h_1, c_1, logp_seq, h_t, c_t = _run_all(False)

    # Sanity-check against the pure-JAX f32 reference (tolerance accommodates
    # the bf16 streamed input / W_ih / W_out; W_hh stays f32).
    logp_ref, (h_ref, c_ref) = _reference_decode(
        xs, h0, c0, w_ih, w_hh, b_ih, b_hh, w_out, b_out)
    tol = dict(atol=3e-2, rtol=3e-2)
    assert logp_1.shape == (1, output_dict_size)
    assert h_1.shape == (1, 1, hidden_size) and c_1.shape == (1, 1, hidden_size)
    assert jnp.allclose(logp_1, logp_ref[0:1], **tol)
    assert jnp.allclose(logp_seq, logp_ref, **tol)
    assert jnp.allclose(h_t, h_ref, **tol)
    assert jnp.allclose(c_t, c_ref, **tol)

    print("KERNEL_OK")
</pallas_src>

<mosaic_0001>
module attributes {stable_mosaic.version = 11 : i64} {
  func.func @_input_gates_kernel(%arg0: i32, %arg1: memref<8x128xbf16, #tpu.memory_space<vmem>>, %arg2: memref<128x512xbf16, #tpu.memory_space<vmem>>, %arg3: memref<1x512xf32, #tpu.memory_space<vmem>>, %arg4: memref<8x512xf32, #tpu.memory_space<vmem>>) attributes {dimension_semantics = [#tpu.dimension_semantics<parallel>], iteration_bounds = array<i64: 1>, scalar_prefetch = 0 : i64, scratch_operands = 0 : i64, tpu.core_type = #tpu.core_type<tc>, window_params = [{transform_indices = @transform_0, window_bounds = array<i64: 8, 128>}, {pipeline_mode = #tpu.pipeline_mode<synchronous>, transform_indices = @transform_1, window_bounds = array<i64: 128, 512>}, {pipeline_mode = #tpu.pipeline_mode<synchronous>, transform_indices = @transform_2, window_bounds = array<i64: 1, 512>}, {transform_indices = @transform_3, window_bounds = array<i64: 8, 512>}]} {
    %c0 = arith.constant 0 : index
    %c0_0 = arith.constant 0 : index
    %0 = vector.load %arg1[%c0, %c0_0] : memref<8x128xbf16, #tpu.memory_space<vmem>>, vector<8x128xbf16>
    %c0_1 = arith.constant 0 : index
    %c0_2 = arith.constant 0 : index
    %1 = vector.load %arg2[%c0_1, %c0_2] : memref<128x512xbf16, #tpu.memory_space<vmem>>, vector<128x512xbf16>
    %cst = arith.constant dense<0.000000e+00> : vector<8x512xf32>
    %2 = tpu.matmul %0, %1, %cst {dimension_numbers = #tpu.dot_dimension_numbers<[1], [0], [0], [1], [0, 0, 1, 1], [], []>} : vector<8x128xbf16>, vector<128x512xbf16>, vector<8x512xf32> -> vector<8x512xf32>
    %c0_3 = arith.constant 0 : index
    %c0_4 = arith.constant 0 : index
    %3 = vector.load %arg3[%c0_3, %c0_4] : memref<1x512xf32, #tpu.memory_space<vmem>>, vector<1x512xf32>
    %4 = vector.broadcast %3 : vector<1x512xf32> to vector<8x512xf32>
    %5 = arith.addf %2, %4 : vector<8x512xf32>
    %c0_5 = arith.constant 0 : index
    %c0_6 = arith.constant 0 : index
    %6 = vector.load %arg4[%c0_5, %c0_6] : memref<8x512xf32, #tpu.memory_space<vmem>>, vector<8x512xf32>
    tpu.vector_store %arg4[%c0_5, %c0_6], %5 {strides = array<i32>} : memref<8x512xf32, #tpu.memory_space<vmem>>, vector<8x512xf32>,
    return
  }
  func.func @transform_0(%arg0: i32) -> (i32, i32) {
    %c0_i32 = arith.constant 0 : i32
    %c0_i32_0 = arith.constant 0 : i32
    return %arg0, %c0_i32 : i32, i32
  }
  func.func @transform_1(%arg0: i32) -> (i32, i32) {
    %c0_i32 = arith.constant 0 : i32
    %c0_i32_0 = arith.constant 0 : i32
    %c0_i32_1 = arith.constant 0 : i32
    return %c0_i32, %c0_i32_0 : i32, i32
  }
  func.func @transform_2(%arg0: i32) -> (i32, i32) {
    %c0_i32 = arith.constant 0 : i32
    %c0_i32_0 = arith.constant 0 : i32
    %c0_i32_1 = arith.constant 0 : i32
    return %c0_i32, %c0_i32_0 : i32, i32
  }
  func.func @transform_3(%arg0: i32) -> (i32, i32) {
    %c0_i32 = arith.constant 0 : i32
    %c0_i32_0 = arith.constant 0 : i32
    return %arg0, %c0_i32 : i32, i32
  }
}

module attributes {stable_mosaic.version = 11 : i64} {
  func.func @_input_gates_kernel(%arg0: i32, %arg1: memref<8x128xbf16, #tpu.memory_space<vmem>>, %arg2: memref<128x512xbf16, #tpu.memory_space<vmem>>, %arg3: memref<1x512xf32, #tpu.memory_space<vmem>>, %arg4: memref<8x512xf32, #tpu.memory_space<vmem>>) attributes {dimension_semantics = [#tpu.dimension_semantics<parallel>], iteration_bounds = array<i64: 1>, scalar_prefetch = 0 : i64, scratch_operands = 0 : i64, tpu.core_type = #tpu.core_type<tc>, window_params = [{transform_indices = @transform_0, window_bounds = array<i64: 8, 128>}, {pipeline_mode = #tpu.pipeline_mode<synchronous>, transform_indices = @transform_1, window_bounds = array<i64: 128, 512>}, {pipeline_mode = #tpu.pipeline_mode<synchronous>, transform_indices = @transform_2, window_bounds = array<i64: 1, 512>}, {transform_indices = @transform_3, window_bounds = array<i64: 8, 512>}]} {
    %c0 = arith.constant 0 : index
    %c0_0 = arith.constant 0 : index
    %0 = vector.load %arg1[%c0, %c0_0] : memref<8x128xbf16, #tpu.memory_space<vmem>>, vector<8x128xbf16>
    %c0_1 = arith.constant 0 : index
    %c0_2 = arith.constant 0 : index
    %1 = vector.load %arg2[%c0_1, %c0_2] : memref<128x512xbf16, #tpu.memory_space<vmem>>, vector<128x512xbf16>
    %cst = arith.constant dense<0.000000e+00> : vector<8x512xf32>
    %2 = tpu.matmul %0, %1, %cst {dimension_numbers = #tpu.dot_dimension_numbers<[1], [0], [0], [1], [0, 0, 1, 1], [], []>} : vector<8x128xbf16>, vector<128x512xbf16>, vector<8x512xf32> -> vector<8x512xf32>
    %c0_3 = arith.constant 0 : index
    %c0_4 = arith.constant 0 : index
    %3 = vector.load %arg3[%c0_3, %c0_4] : memref<1x512xf32, #tpu.memory_space<vmem>>, vector<1x512xf32>
    %4 = vector.broadcast %3 : vector<1x512xf32> to vector<8x512xf32>
    %5 = arith.addf %2, %4 : vector<8x512xf32>
    %c0_5 = arith.constant 0 : index
    %c0_6 = arith.constant 0 : index
    %6 = vector.load %arg4[%c0_5, %c0_6] : memref<8x512xf32, #tpu.memory_space<vmem>>, vector<8x512xf32>
    tpu.vector_store %arg4[%c0_5, %c0_6], %5 {strides = array<i32>} : memref<8x512xf32, #tpu.memory_space<vmem>>, vector<8x512xf32>,
    return
  }
  func.func @transform_0(%arg0: i32) -> (i32, i32) {
    %c0_i32 = arith.constant 0 : i32
    %c0_i32_0 = arith.constant 0 : i32
    return %arg0, %c0_i32 : i32, i32
  }
  func.func @transform_1(%arg0: i32) -> (i32, i32) {
    %c0_i32 = arith.constant 0 : i32
    %c0_i32_0 = arith.constant 0 : i32
    %c0_i32_1 = arith.constant 0 : i32
    return %c0_i32, %c0_i32_0 : i32, i32
  }
  func.func @transform_2(%arg0: i32) -> (i32, i32) {
    %c0_i32 = arith.constant 0 : i32
    %c0_i32_0 = arith.constant 0 : i32
    %c0_i32_1 = arith.constant 0 : i32
    return %c0_i32, %c0_i32_0 : i32, i32
  }
  func.func @transform_3(%arg0: i32) -> (i32, i32) {
    %c0_i32 = arith.constant 0 : i32
    %c0_i32_0 = arith.constant 0 : i32
    return %arg0, %c0_i32 : i32, i32
  }
}

</mosaic_0001>

<bundles_post_ra>
// kernel: tpu_custom_call.1
= control target key start
LH: loop header
LB: loop body
LE: loop exit
PB: predicated region body
PF: predicated region fallthrough
CT: control target
= control target key end

     0   :  { %8 = vsyncpa [#allocation3], 0  ;;  %s589_s0 = inlined_call_operand.hbm [shape: bf16[8,128], index: 0, kind: input, shape index: {}]   ;;  %s590_s1 = inlined_call_operand.hbm [shape: bf16[128,512], index: 1, kind: input, shape index: {}]   ;;  %s591_s2 = inlined_call_operand.vmem [shape: f32[1,512], index: 2, kind: input, shape index: {}]   ;;  %s592_s3 = inlined_call_operand.hbm [shape: f32[8,512], index: 3, kind: output, shape index: {}]  }
   0x1   :  { %9 = vsyncpa [#allocation6], 0 }
   0x2   :  { %10 = vsyncpa [#allocation4], 0  ;;  %s517_s12 = smov [#allocation2]   ;;  %s518_s14 = smov [#allocation5]  }
   0x3   :  { %s17_s13 = sshll.u32 %s517_s12, 4  ;;  %s26_s15 = sshll.u32 %s518_s14, 4  ;;  %s18_s13 = int_to_ptr.vmem [resolvable:$true] %s17_s13  ;;  %s543_s15 = int_to_ptr.vmem [resolvable:$true] %s26_s15 }
   0x4   :  { %s445_s18 = scalar_lea.hbm %s589_s0, 64 }
   0x5   :  { %p446_p0 = scmp.ne.s32.totalorder %s589_s0, %s445_s18  ;;  %p449_p1 = scmp.lt.u32.totalorder %s445_s18, %s589_s0 }
   0x7   :  { %p451_p2 = pnand %p449_p1, %p446_p0 }
   0x9   :  { %454 = shalt.err (!%p451_p2)
}
   0xa   :  { %s455_s23 = scalar_lea.vmem %s18_s13, 64  ;;  %p460_p4 = scmp.lt.s32.totalorder %s18_s13, %s18_s13 }
   0xb   :  { %p456_p3 = scmp.ne.s32.totalorder %s18_s13, %s455_s23  ;;  %p461_p5 = scmp.lt.s32.totalorder %s455_s23, %s455_s23 }
   0xd   :  { %p462_p6 = por %p461_p5, %p460_p4 }
   0xf   :  { %p463_p7 = pnand %p462_p6, %p456_p3 }
  0x11   :  { %466 = shalt.err (!%p463_p7)
}
  0x12   :  { %20 = dma.hbm_to_vmem [thread:$0]  %s589_s0, 64, %s18_s13, [#allocation3]  }
  0x13   :  { %s467_s28 = scalar_lea.hbm %s590_s1, 4096 }
  0x14   :  { %p468_p8 = scmp.ne.s32.totalorder %s590_s1, %s467_s28  ;;  %p471_p9 = scmp.lt.u32.totalorder %s467_s28, %s590_s1 }
  0x16   :  { %p473_p10 = pnand %p471_p9, %p468_p8 }
  0x18   :  { %476 = shalt.err (!%p473_p10)
}
  0x19   :  { %s477_s6 = scalar_lea.vmem %s543_s15, 4096  ;;  %p482_p12 = scmp.lt.s32.totalorder %s543_s15, %s543_s15 }
  0x1a   :  { %p478_p11 = scmp.ne.s32.totalorder %s543_s15, %s477_s6  ;;  %p483_p13 = scmp.lt.s32.totalorder %s477_s6, %s477_s6 }
  0x1c   :  { %p484_p0 = por %p483_p13, %p482_p12 }
  0x1e   :  { %p485_p1 = pnand %p484_p0, %p478_p11 }
  0x20   :  { %488 = shalt.err (!%p485_p1)
}
  0x21   :  { %s519_s0 = smov 256   ;;  %s520_s7 = smov 16  }
  0x22   :  { %32 = dma.hbm_to_vmem [thread:$0]  %s590_s1, 4096, %s543_s15, [#allocation6], %s519_s0, %s519_s0, %s520_s7  }
  0x23   :  { %511 = dma.done.wait [#allocation3], 64  }
  0x24   :  { %512 = vsyncadd [#allocation3], 4294967232 }
  0x25   :  { %513 = dma.done.wait [#allocation6], 4096  }
  0x26   :  { %514 = vsyncadd [#allocation6], 4294963200  ;;  %v521_v0 = vmov 0   ;;  %v397_v1 = vld [vmem:[#allocation5 + $0x4] ss:$16 sps:$4 sm:$0xff]   ;;  %v77_v34 = vlaneseq  ;;  %s522_s11 = smov [#allocation7]  }
  0x27   :  { %289 = vmatprep.mubr.bf16.mxu0 %v521_v0  ;;  %330 = vmatprep.mubr.bf16.mxu1 %v521_v0  ;;  %v399_v2 = vld [vmem:[#allocation5 + $0xc] ss:$16 sps:$4 sm:$0xff]   ;;  %v401_v3 = vld [vmem:[#allocation5] ss:$16 sps:$4 sm:$0xff]   ;;  %v402_v4 = vld [vmem:[#allocation5 + $0x8] ss:$16 sps:$4 sm:$0xff]  }
  0x28   :  { %257 = vmatprep.subr.bf16.mxu0 %v397_v1  ;;  %298 = vmatprep.subr.bf16.mxu1 %v399_v2  ;;  %v403_v5 = vld [vmem:[#allocation5 + $0x24] ss:$16 sps:$4 sm:$0xff]   ;;  %v405_v6 = vld [vmem:[#allocation5 + $0x2c] ss:$16 sps:$4 sm:$0xff]   ;;  %v407_v7 = vld [vmem:[#allocation5 + $0x20] ss:$16 sps:$4 sm:$0xff]  }
  0x29   :  { %258 = vmatpush1.bf16.msra.mxu0 %v401_v3  ;;  %299 = vmatpush1.bf16.msra.mxu1 %v402_v4  ;;  %v408_v8 = vld [vmem:[#allocation5 + $0x28] ss:$16 sps:$4 sm:$0xff]   ;;  %v409_v9 = vld [vmem:[#allocation5 + $0x44] ss:$16 sps:$4 sm:$0xff]   ;;  %v411_v10 = vld [vmem:[#allocation5 + $0x4c] ss:$16 sps:$4 sm:$0xff]  }
  0x2a   :  { %259 = vmatprep.subr.bf16.mxu0 %v403_v5  ;;  %300 = vmatprep.subr.bf16.mxu1 %v405_v6  ;;  %v413_v11 = vld [vmem:[#allocation5 + $0x40] ss:$16 sps:$4 sm:$0xff]   ;;  %v414_v12 = vld [vmem:[#allocation5 + $0x48] ss:$16 sps:$4 sm:$0xff]   ;;  %v415_v13 = vld [vmem:[#allocation5 + $0x64] ss:$16 sps:$4 sm:$0xff]  }
  0x2b   :  { %v417_v14 = vld [vmem:[#allocation5 + $0x6c] ss:$16 sps:$4 sm:$0xff]   ;;  %v419_v15 = vld [vmem:[#allocation5 + $0x60] ss:$16 sps:$4 sm:$0xff]   ;;  %v420_v16 = vld [vmem:[#allocation5 + $0x68] ss:$16 sps:$4 sm:$0xff]  }
  0x2c   :  { %v421_v17 = vld [vmem:[#allocation5 + $0x84] ss:$16 sps:$4 sm:$0xff]   ;;  %v423_v18 = vld [vmem:[#allocation5 + $0x8c] ss:$16 sps:$4 sm:$0xff]   ;;  %v425_v19 = vld [vmem:[#allocation5 + $0x80] ss:$16 sps:$4 sm:$0xff]  }
  0x2d   :  { %260 = vmatpush1.bf16.msra.mxu0 %v407_v7  ;;  %301 = vmatpush1.bf16.msra.mxu1 %v408_v8  ;;  %v426_v20 = vld [vmem:[#allocation5 + $0x88] ss:$16 sps:$4 sm:$0xff]   ;;  %v427_v21 = vld [vmem:[#allocation5 + $0xa4] ss:$16 sps:$4 sm:$0xff]   ;;  %v429_v22 = vld [vmem:[#allocation5 + $0xac] ss:$16 sps:$4 sm:$0xff]  }
  0x2e   :  { %261 = vmatprep.subr.bf16.mxu0 %v409_v9  ;;  %302 = vmatprep.subr.bf16.mxu1 %v411_v10  ;;  %v431_v23 = vld [vmem:[#allocation5 + $0xa0] ss:$16 sps:$4 sm:$0xff]   ;;  %v432_v24 = vld [vmem:[#allocation5 + $0xa8] ss:$16 sps:$4 sm:$0xff]   ;;  %v433_v25 = vld [vmem:[#allocation5 + $0xc4] ss:$16 sps:$4 sm:$0xff]  }
  0x2f   :  { %v435_v26 = vld [vmem:[#allocation5 + $0xcc] ss:$16 sps:$4 sm:$0xff]   ;;  %v437_v27 = vld [vmem:[#allocation5 + $0xc0] ss:$16 sps:$4 sm:$0xff]   ;;  %v438_v28 = vld [vmem:[#allocation5 + $0xc8] ss:$16 sps:$4 sm:$0xff]  }
  0x30   :  { %v439_v29 = vld [vmem:[#allocation5 + $0xe4] ss:$16 sps:$4 sm:$0xff]   ;;  %v441_v30 = vld [vmem:[#allocation5 + $0xec] ss:$16 sps:$4 sm:$0xff]   ;;  %v443_v31 = vld [vmem:[#allocation5 + $0xe0] ss:$16 sps:$4 sm:$0xff]  }
  0x31   :  { %262 = vmatpush1.bf16.msra.mxu0 %v413_v11  ;;  %303 = vmatpush1.bf16.msra.mxu1 %v414_v12  ;;  %v444_v32 = vld [vmem:[#allocation5 + $0xe8] ss:$16 sps:$4 sm:$0xff]   ;;  %v42_v33 = vld [vmem:[#allocation2] sm:$0xf]  ;;  %v78_v35 = vshrl.u32 %v77_v34, 7  ;;  %s349_s12 = sshll.u32 %s522_s11, 4  ;;  %s350_s12 = int_to_ptr.vmem [resolvable:$true] %s349_s12 }
  0x32   :  { %263 = vmatprep.subr.bf16.mxu0 %v415_v13  ;;  %304 = vmatprep.subr.bf16.mxu1 %v417_v14  ;;  %v75_v38 = vld [vmem:[%s591_s2] sm:$0xf]  ;;  %s489_s2 = scalar_lea.vmem %s350_s12, 512  ;;  %p494_p3 = scmp.lt.s32.totalorder %s350_s12, %s350_s12 }
  0x33   :  { %v79_v36 = vsub.s32 0, %v78_v35  ;;  %v87_v37 = vsub.s32 2, %v78_v35  ;;  %v83_v39 = vsub.s32 1, %v78_v35  ;;  %v91_v40 = vsub.s32 3, %v78_v35  ;;  %p490_p2 = scmp.ne.s32.totalorder %s350_s12, %s489_s2  ;;  %p495_p4 = scmp.lt.s32.totalorder %s489_s2, %s489_s2 }
  0x35   :  { %264 = vmatpush1.bf16.msra.mxu0 %v419_v15  ;;  %305 = vmatpush1.bf16.msra.mxu1 %v420_v16  ;;  %v80_v41 = vrot.slane %v75_v38, %v79_v36  ;;  %v88_v42 = vrot.slane %v75_v38, %v87_v37  ;;  %v84_v43 = vrot.slane %v75_v38, %v83_v39  ;;  %p496_p5 = por %p495_p4, %p494_p3 }
  0x36   :  { %265 = vmatprep.subr.bf16.mxu0 %v421_v17  ;;  %306 = vmatprep.subr.bf16.mxu1 %v423_v18  ;;  %v92_v44 = vrot.slane %v75_v38, %v91_v40 }
  0x37   :  { %p497_p6 = pnand %p496_p5, %p490_p2 }
  0x39   :  { %266 = vmatpush1.bf16.msra.mxu0 %v425_v19  ;;  %307 = vmatpush1.bf16.msra.mxu1 %v426_v20 }
  0x3a   :  { %267 = vmatprep.subr.bf16.mxu0 %v427_v21  ;;  %308 = vmatprep.subr.bf16.mxu1 %v429_v22 }
  0x3d   :  { %268 = vmatpush1.bf16.msra.mxu0 %v431_v23  ;;  %309 = vmatpush1.bf16.msra.mxu1 %v432_v24 }
  0x3e   :  { %269 = vmatprep.subr.bf16.mxu0 %v433_v25  ;;  %310 = vmatprep.subr.bf16.mxu1 %v435_v26 }
  0x41   :  { %270 = vmatpush1.bf16.msra.mxu0 %v437_v27  ;;  %311 = vmatpush1.bf16.msra.mxu1 %v438_v28 }
  0x42   :  { %271 = vmatprep.subr.bf16.mxu0 %v439_v29  ;;  %312 = vmatprep.subr.bf16.mxu1 %v441_v30 }
  0x45   :  { %272 = vmatpush1.bf16.msra.mxu0 %v443_v31  ;;  %313 = vmatpush1.bf16.msra.mxu1 %v444_v32 }
  0x48   :  { %290 = vmatmul.mubr.bf16.vlgmr.msra.gmra.mrb[0].mxu0 %v42_v33  ;;  %331 = vmatmul.mubr.bf16.vlgmr.msra.gmra.mrb[0].mxu1 %v42_v33 }
 0x11b   :  { %v291_v45 = vpop.f32.mrb[0].mxu0  ;;  %v332_v46 = vpop.f32.mrb[0].mxu1 }
 0x11c   :  { %v292_v47 = vadd.f32 %v291_v45, %v80_v41  ;;  %v333_v48 = vadd.f32 %v332_v46, %v88_v42  ;;  %v293_v49 = vpop.f32.mrb[1].mxu0  ;;  %v334_v50 = vpop.f32.mrb[1].mxu1 }
 0x11d   :  { %v294_v51 = vadd.f32 %v293_v49, %v84_v43  ;;  %v335_v52 = vadd.f32 %v334_v50, %v92_v44  ;;  %v295_v53 = vpop.f32.mrb[2].mxu0  ;;  %v336_v54 = vpop.f32.mrb[2].mxu1 }
 0x11e   :  { %339 = vst [vmem:[#allocation7] sm:$0xff] %v292_v47  ;;  %341 = vst [vmem:[#allocation7 + $0x10] sm:$0xff] %v333_v48  ;;  %v296_v55 = vpop.f32.mrb[3].mxu0  ;;  %v337_v56 = vpop.f32.mrb[3].mxu1 }
 0x11f   :  { %340 = vst [vmem:[#allocation7 + $0x8] sm:$0xff] %v294_v51  ;;  %342 = vst [vmem:[#allocation7 + $0x18] sm:$0xff] %v335_v52 }
 0x120   :  { %500 = shalt.err (!%p497_p6)
}
 0x121   :  { %s501_s15 = scalar_lea.hbm %s592_s3, 512 }
 0x122   :  { %p502_p7 = scmp.ne.s32.totalorder %s592_s3, %s501_s15  ;;  %p505_p8 = scmp.lt.u32.totalorder %s501_s15, %s592_s3 }
 0x124   :  { %p507_p9 = pnand %p505_p8, %p502_p7 }
 0x126   :  { %510 = shalt.err (!%p507_p9)
}
 0x127   :  { %352 = dma.vmem_to_hbm [thread:$0]  %s350_s12, 512, %s592_s3, [#allocation4]  }
 0x128   :  { %515 = dma.done.wait [#allocation4], 512  }
 0x129   :  { %516 = vsyncadd [#allocation4], 4294966784 }
 0x12a   :  { %356 = vsyncpa [#allocation3], 1 }
 0x12b   :  { %357 = vsyncpa [#allocation6], 1 }
 0x12c   :  { %358 = vsyncpa [#allocation4], 1 }

// kernel: tpu_custom_call.1
= control target key start
LH: loop header
LB: loop body
LE: loop exit
PB: predicated region body
PF: predicated region fallthrough
CT: control target
= control target key end

     0   :  { %8 = vsyncpa [#allocation3], 0  ;;  %s589_s0 = inlined_call_operand.hbm [shape: bf16[8,128], index: 0, kind: input, shape index: {}]   ;;  %s590_s1 = inlined_call_operand.hbm [shape: bf16[128,512], index: 1, kind: input, shape index: {}]   ;;  %s591_s2 = inlined_call_operand.vmem [shape: f32[1,512], index: 2, kind: input, shape index: {}]   ;;  %s592_s3 = inlined_call_operand.hbm [shape: f32[8,512], index: 3, kind: output, shape index: {}]  }
   0x1   :  { %9 = vsyncpa [#allocation6], 0 }
   0x2   :  { %10 = vsyncpa [#allocation4], 0  ;;  %s517_s12 = smov [#allocation2]   ;;  %s518_s14 = smov [#allocation5]  }
   0x3   :  { %s17_s13 = sshll.u32 %s517_s12, 4  ;;  %s26_s15 = sshll.u32 %s518_s14, 4  ;;  %s18_s13 = int_to_ptr.vmem [resolvable:$true] %s17_s13  ;;  %s543_s15 = int_to_ptr.vmem [resolvable:$true] %s26_s15 }
   0x4   :  { %s445_s18 = scalar_lea.hbm %s589_s0, 64 }
   0x5   :  { %p446_p0 = scmp.ne.s32.totalorder %s589_s0, %s445_s18  ;;  %p449_p1 = scmp.lt.u32.totalorder %s445_s18, %s589_s0 }
   0x7   :  { %p451_p2 = pnand %p449_p1, %p446_p0 }
   0x9   :  { %454 = shalt.err (!%p451_p2)
}
   0xa   :  { %s455_s23 = scalar_lea.vmem %s18_s13, 64  ;;  %p460_p4 = scmp.lt.s32.totalorder %s18_s13, %s18_s13 }
   0xb   :  { %p456_p3 = scmp.ne.s32.totalorder %s18_s13, %s455_s23  ;;  %p461_p5 = scmp.lt.s32.totalorder %s455_s23, %s455_s23 }
   0xd   :  { %p462_p6 = por %p461_p5, %p460_p4 }
   0xf   :  { %p463_p7 = pnand %p462_p6, %p456_p3 }
  0x11   :  { %466 = shalt.err (!%p463_p7)
}
  0x12   :  { %20 = dma.hbm_to_vmem [thread:$0]  %s589_s0, 64, %s18_s13, [#allocation3]  }
  0x13   :  { %s467_s28 = scalar_lea.hbm %s590_s1, 4096 }
  0x14   :  { %p468_p8 = scmp.ne.s32.totalorder %s590_s1, %s467_s28  ;;  %p471_p9 = scmp.lt.u32.totalorder %s467_s28, %s590_s1 }
  0x16   :  { %p473_p10 = pnand %p471_p9, %p468_p8 }
  0x18   :  { %476 = shalt.err (!%p473_p10)
}
  0x19   :  { %s477_s6 = scalar_lea.vmem %s543_s15, 4096  ;;  %p482_p12 = scmp.lt.s32.totalorder %s543_s15, %s543_s15 }
  0x1a   :  { %p478_p11 = scmp.ne.s32.totalorder %s543_s15, %s477_s6  ;;  %p483_p13 = scmp.lt.s32.totalorder %s477_s6, %s477_s6 }
  0x1c   :  { %p484_p0 = por %p483_p13, %p482_p12 }
  0x1e   :  { %p485_p1 = pnand %p484_p0, %p478_p11 }
  0x20   :  { %488 = shalt.err (!%p485_p1)
}
  0x21   :  { %s519_s0 = smov 256   ;;  %s520_s7 = smov 16  }
  0x22   :  { %32 = dma.hbm_to_vmem [thread:$0]  %s590_s1, 4096, %s543_s15, [#allocation6], %s519_s0, %s519_s0, %s520_s7  }
  0x23   :  { %511 = dma.done.wait [#allocation3], 64  }
  0x24   :  { %512 = vsyncadd [#allocation3], 4294967232 }
  0x25   :  { %513 = dma.done.wait [#allocation6], 4096  }
  0x26   :  { %514 = vsyncadd [#allocation6], 4294963200  ;;  %v521_v0 = vmov 0   ;;  %v397_v1 = vld [vmem:[#allocation5 + $0x4] ss:$16 sps:$4 sm:$0xff]   ;;  %v77_v34 = vlaneseq  ;;  %s522_s11 = smov [#allocation7]  }
  0x27   :  { %289 = vmatprep.mubr.bf16.mxu0 %v521_v0  ;;  %330 = vmatprep.mubr.bf16.mxu1 %v521_v0  ;;  %v399_v2 = vld [vmem:[#allocation5 + $0xc] ss:$16 sps:$4 sm:$0xff]   ;;  %v401_v3 = vld [vmem:[#allocation5] ss:$16 sps:$4 sm:$0xff]   ;;  %v402_v4 = vld [vmem:[#allocation5 + $0x8] ss:$16 sps:$4 sm:$0xff]  }
  0x28   :  { %257 = vmatprep.subr.bf16.mxu0 %v397_v1  ;;  %298 = vmatprep.subr.bf16.mxu1 %v399_v2  ;;  %v403_v5 = vld [vmem:[#allocation5 + $0x24] ss:$16 sps:$4 sm:$0xff]   ;;  %v405_v6 = vld [vmem:[#allocation5 + $0x2c] ss:$16 sps:$4 sm:$0xff]   ;;  %v407_v7 = vld [vmem:[#allocation5 + $0x20] ss:$16 sps:$4 sm:$0xff]  }
  0x29   :  { %258 = vmatpush1.bf16.msra.mxu0 %v401_v3  ;;  %299 = vmatpush1.bf16.msra.mxu1 %v402_v4  ;;  %v408_v8 = vld [vmem:[#allocation5 + $0x28] ss:$16 sps:$4 sm:$0xff]   ;;  %v409_v9 = vld [vmem:[#allocation5 + $0x44] ss:$16 sps:$4 sm:$0xff]   ;;  %v411_v10 = vld [vmem:[#allocation5 + $0x4c] ss:$16 sps:$4 sm:$0xff]  }
  0x2a   :  { %259 = vmatprep.subr.bf16.mxu0 %v403_v5  ;;  %300 = vmatprep.subr.bf16.mxu1 %v405_v6  ;;  %v413_v11 = vld [vmem:[#allocation5 + $0x40] ss:$16 sps:$4 sm:$0xff]   ;;  %v414_v12 = vld [vmem:[#allocation5 + $0x48] ss:$16 sps:$4 sm:$0xff]   ;;  %v415_v13 = vld [vmem:[#allocation5 + $0x64] ss:$16 sps:$4 sm:$0xff]  }
  0x2b   :  { %v417_v14 = vld [vmem:[#allocation5 + $0x6c] ss:$16 sps:$4 sm:$0xff]   ;;  %v419_v15 = vld [vmem:[#allocation5 + $0x60] ss:$16 sps:$4 sm:$0xff]   ;;  %v420_v16 = vld [vmem:[#allocation5 + $0x68] ss:$16 sps:$4 sm:$0xff]  }
  0x2c   :  { %v421_v17 = vld [vmem:[#allocation5 + $0x84] ss:$16 sps:$4 sm:$0xff]   ;;  %v423_v18 = vld [vmem:[#allocation5 + $0x8c] ss:$16 sps:$4 sm:$0xff]   ;;  %v425_v19 = vld [vmem:[#allocation5 + $0x80] ss:$16 sps:$4 sm:$0xff]  }
  0x2d   :  { %260 = vmatpush1.bf16.msra.mxu0 %v407_v7  ;;  %301 = vmatpush1.bf16.msra.mxu1 %v408_v8  ;;  %v426_v20 = vld [vmem:[#allocation5 + $0x88] ss:$16 sps:$4 sm:$0xff]   ;;  %v427_v21 = vld [vmem:[#allocation5 + $0xa4] ss:$16 sps:$4 sm:$0xff]   ;;  %v429_v22 = vld [vmem:[#allocation5 + $0xac] ss:$16 sps:$4 sm:$0xff]  }
  0x2e   :  { %261 = vmatprep.subr.bf16.mxu0 %v409_v9  ;;  %302 = vmatprep.subr.bf16.mxu1 %v411_v10  ;;  %v431_v23 = vld [vmem:[#allocation5 + $0xa0] ss:$16 sps:$4 sm:$0xff]   ;;  %v432_v24 = vld [vmem:[#allocation5 + $0xa8] ss:$16 sps:$4 sm:$0xff]   ;;  %v433_v25 = vld [vmem:[#allocation5 + $0xc4] ss:$16 sps:$4 sm:$0xff]  }
  0x2f   :  { %v435_v26 = vld [vmem:[#allocation5 + $0xcc] ss:$16 sps:$4 sm:$0xff]   ;;  %v437_v27 = vld [vmem:[#allocation5 + $0xc0] ss:$16 sps:$4 sm:$0xff]   ;;  %v438_v28 = vld [vmem:[#allocation5 + $0xc8] ss:$16 sps:$4 sm:$0xff]  }
  0x30   :  { %v439_v29 = vld [vmem:[#allocation5 + $0xe4] ss:$16 sps:$4 sm:$0xff]   ;;  %v441_v30 = vld [vmem:[#allocation5 + $0xec] ss:$16 sps:$4 sm:$0xff]   ;;  %v443_v31 = vld [vmem:[#allocation5 + $0xe0] ss:$16 sps:$4 sm:$0xff]  }
  0x31   :  { %262 = vmatpush1.bf16.msra.mxu0 %v413_v11  ;;  %303 = vmatpush1.bf16.msra.mxu1 %v414_v12  ;;  %v444_v32 = vld [vmem:[#allocation5 + $0xe8] ss:$16 sps:$4 sm:$0xff]   ;;  %v42_v33 = vld [vmem:[#allocation2] sm:$0xf]  ;;  %v78_v35 = vshrl.u32 %v77_v34, 7  ;;  %s349_s12 = sshll.u32 %s522_s11, 4  ;;  %s350_s12 = int_to_ptr.vmem [resolvable:$true] %s349_s12 }
  0x32   :  { %263 = vmatprep.subr.bf16.mxu0 %v415_v13  ;;  %304 = vmatprep.subr.bf16.mxu1 %v417_v14  ;;  %v75_v38 = vld [vmem:[%s591_s2] sm:$0xf]  ;;  %s489_s2 = scalar_lea.vmem %s350_s12, 512  ;;  %p494_p3 = scmp.lt.s32.totalorder %s350_s12, %s350_s12 }
  0x33   :  { %v79_v36 = vsub.s32 0, %v78_v35  ;;  %v87_v37 = vsub.s32 2, %v78_v35  ;;  %v83_v39 = vsub.s32 1, %v78_v35  ;;  %v91_v40 = vsub.s32 3, %v78_v35  ;;  %p490_p2 = scmp.ne.s32.totalorder %s350_s12, %s489_s2  ;;  %p495_p4 = scmp.lt.s32.totalorder %s489_s2, %s489_s2 }
  0x35   :  { %264 = vmatpush1.bf16.msra.mxu0 %v419_v15  ;;  %305 = vmatpush1.bf16.msra.mxu1 %v420_v16  ;;  %v80_v41 = vrot.slane %v75_v38, %v79_v36  ;;  %v88_v42 = vrot.slane %v75_v38, %v87_v37  ;;  %v84_v43 = vrot.slane %v75_v38, %v83_v39  ;;  %p496_p5 = por %p495_p4, %p494_p3 }
  0x36   :  { %265 = vmatprep.subr.bf16.mxu0 %v421_v17  ;;  %306 = vmatprep.subr.bf16.mxu1 %v423_v18  ;;  %v92_v44 = vrot.slane %v75_v38, %v91_v40 }
  0x37   :  { %p497_p6 = pnand %p496_p5, %p490_p2 }
  0x39   :  { %266 = vmatpush1.bf16.msra.mxu0 %v425_v19  ;;  %307 = vmatpush1.bf16.msra.mxu1 %v426_v20 }
  0x3a   :  { %267 = vmatprep.subr.bf16.mxu0 %v427_v21  ;;  %308 = vmatprep.subr.bf16.mxu1 %v429_v22 }
  0x3d   :  { %268 = vmatpush1.bf16.msra.mxu0 %v431_v23  ;;  %309 = vmatpush1.bf16.msra.mxu1 %v432_v24 }
  0x3e   :  { %269 = vmatprep.subr.bf16.mxu0 %v433_v25  ;;  %310 = vmatprep.subr.bf16.mxu1 %v435_v26 }
  0x41   :  { %270 = vmatpush1.bf16.msra.mxu0 %v437_v27  ;;  %311 = vmatpush1.bf16.msra.mxu1 %v438_v28 }
  0x42   :  { %271 = vmatprep.subr.bf16.mxu0 %v439_v29  ;;  %312 = vmatprep.subr.bf16.mxu1 %v441_v30 }
  0x45   :  { %272 = vmatpush1.bf16.msra.mxu0 %v443_v31  ;;  %313 = vmatpush1.bf16.msra.mxu1 %v444_v32 }
  0x48   :  { %290 = vmatmul.mubr.bf16.vlgmr.msra.gmra.mrb[0].mxu0 %v42_v33  ;;  %331 = vmatmul.mubr.bf16.vlgmr.msra.gmra.mrb[0].mxu1 %v42_v33 }
 0x11b   :  { %v291_v45 = vpop.f32.mrb[0].mxu0  ;;  %v332_v46 = vpop.f32.mrb[0].mxu1 }
 0x11c   :  { %v292_v47 = vadd.f32 %v291_v45, %v80_v41  ;;  %v333_v48 = vadd.f32 %v332_v46, %v88_v42  ;;  %v293_v49 = vpop.f32.mrb[1].mxu0  ;;  %v334_v50 = vpop.f32.mrb[1].mxu1 }
 0x11d   :  { %v294_v51 = vadd.f32 %v293_v49, %v84_v43  ;;  %v335_v52 = vadd.f32 %v334_v50, %v92_v44  ;;  %v295_v53 = vpop.f32.mrb[2].mxu0  ;;  %v336_v54 = vpop.f32.mrb[2].mxu1 }
 0x11e   :  { %339 = vst [vmem:[#allocation7] sm:$0xff] %v292_v47  ;;  %341 = vst [vmem:[#allocation7 + $0x10] sm:$0xff] %v333_v48  ;;  %v296_v55 = vpop.f32.mrb[3].mxu0  ;;  %v337_v56 = vpop.f32.mrb[3].mxu1 }
 0x11f   :  { %340 = vst [vmem:[#allocation7 + $0x8] sm:$0xff] %v294_v51  ;;  %342 = vst [vmem:[#allocation7 + $0x18] sm:$0xff] %v335_v52 }
 0x120   :  { %500 = shalt.err (!%p497_p6)
}
 0x121   :  { %s501_s15 = scalar_lea.hbm %s592_s3, 512 }
 0x122   :  { %p502_p7 = scmp.ne.s32.totalorder %s592_s3, %s501_s15  ;;  %p505_p8 = scmp.lt.u32.totalorder %s501_s15, %s592_s3 }
 0x124   :  { %p507_p9 = pnand %p505_p8, %p502_p7 }
 0x126   :  { %510 = shalt.err (!%p507_p9)
}
 0x127   :  { %352 = dma.vmem_to_hbm [thread:$0]  %s350_s12, 512, %s592_s3, [#allocation4]  }
 0x128   :  { %515 = dma.done.wait [#allocation4], 512  }
 0x129   :  { %516 = vsyncadd [#allocation4], 4294966784 }
 0x12a   :  { %356 = vsyncpa [#allocation3], 1 }
 0x12b   :  { %357 = vsyncpa [#allocation6], 1 }
 0x12c   :  { %358 = vsyncpa [#allocation4], 1 }

</bundles_post_ra>
